<compile_context>
chip_gen: v7x
topology: tpu7x:2x2x1
jax: 0.10.0
libtpu: 0.0.40
codegen_flags: <defaults>
</compile_context>

<pallas_src>
import jax
import jax.numpy as jnp
from jax.experimental import pallas as pl
from jax.experimental.pallas import tpu as pltpu


def _hbm_copy_kernel(x_hbm, o_hbm, sem):
    # Single whole-tensor HBM->HBM DMA. Source and destination have identical
    # shape/layout (the wrapper applies the metadata-only reshape before the
    # call), so this is a straight linear copy handled by the DMA engine —
    # nothing ever touches VMEM or vregs.
    cp = pltpu.make_async_copy(x_hbm, o_hbm, sem.at[0])
    cp.start()
    cp.wait()


def _pallas_hbm_copy(x):
    nbytes = x.size * jnp.dtype(x.dtype).itemsize
    return pl.pallas_call(
        _hbm_copy_kernel,
        out_shape=jax.ShapeDtypeStruct(x.shape, x.dtype),
        in_specs=[pl.BlockSpec(memory_space=pl.ANY)],
        out_specs=pl.BlockSpec(memory_space=pl.ANY),
        scratch_shapes=[pltpu.SemaphoreType.DMA((1,))],
        cost_estimate=pl.CostEstimate(
            flops=0, transcendentals=0, bytes_accessed=2 * nbytes),
    )(x)


def resize_layer_forward(x, channel, size, *, force_pallas_copy=False,
                         min_pallas_bytes=512 * 1024):
    """Pallas/JAX equivalent of resize_layer(channel, size).forward(x).

    x: array with leading batch dim B and channel*size*size elements per batch
       (same contract as torch .view()).
    returns: array of shape (B, channel, size, size), same dtype as x.
    """
    B = x.shape[0]
    N = channel * size * size
    per_batch = 1
    for d in x.shape[1:]:
        per_batch *= d
    assert per_batch == N, (
        f"cannot view input with per-batch {per_batch} elems as "
        f"({channel},{size},{size}) = {N} elems")

    out_shape = (B, channel, size, size)
    # torch .view() is metadata-only; so is XLA reshape. No HBM traffic.
    x_view = x.reshape(out_shape)

    if not force_pallas_copy:
        return x_view

    nbytes = x_view.size * jnp.dtype(x_view.dtype).itemsize
    if nbytes < min_pallas_bytes:
        # Below the gate, pallas_call launch + DMA-issue overhead dominates;
        # the metadata-only view is semantically identical, so return it.
        return x_view

    # Explicit data-movement path: one HBM->HBM DMA, no padding, no tiling.
    return _pallas_hbm_copy(x_view)


if __name__ == "__main__":
    # resize_layer(channel=4, size=16): per-example element count = 4*16*16.
    # Feed an input of a *different* 4-D shape with the same element count so
    # the reshape is actually exercised: (2, 16, 8, 8) -> (2, 4, 16, 16).
    channel, size = 4, 16
    B = 2
    key = jax.random.PRNGKey(0)
    x = jax.random.normal(key, (B, 16, 8, 8), dtype=jnp.float32)

    y_ref = x.reshape(B, channel, size, size)

    # Default fast path: metadata-only reshape (matches torch .view() cost).
    y_fast = jax.block_until_ready(resize_layer_forward(x, channel, size))

    # Pallas DMA-copy path: min_pallas_bytes=0 so the kernel is exercised once
    # even at this small demo size (in production the size gate keeps tiny
    # tensors off the Pallas path).
    y_pallas = jax.block_until_ready(
        resize_layer_forward(x, channel, size,
                             force_pallas_copy=True, min_pallas_bytes=0))

    assert y_fast.shape == (B, channel, size, size)
    assert y_pallas.shape == (B, channel, size, size)
    assert y_pallas.dtype == x.dtype
    assert bool(jnp.array_equal(y_fast, y_ref))
    assert bool(jnp.array_equal(y_pallas, y_ref))

    print("KERNEL_OK")
</pallas_src>

<mosaic_0001>
module attributes {stable_mosaic.version = 11 : i64} {
  func.func @_hbm_copy_kernel(%arg0: memref<2x4x16x16xf32, #tpu.memory_space<any>>, %arg1: memref<2x4x16x16xf32, #tpu.memory_space<any>>, %arg2: memref<1x!tpu.dma_semaphore, #tpu.memory_space<semaphore_mem>>) attributes {dimension_semantics = [], scalar_prefetch = 0 : i64, scratch_operands = 1 : i64, tpu.core_type = #tpu.core_type<tc>} {
    %c0_i32 = arith.constant 0 : i32
    %0 = tpu.memref_slice %arg2[%c0_i32] : memref<1x!tpu.dma_semaphore, #tpu.memory_space<semaphore_mem>> -> memref<1x!tpu.dma_semaphore, #tpu.memory_space<semaphore_mem>>
    %1 = tpu.memref_squeeze %0 : memref<1x!tpu.dma_semaphore, #tpu.memory_space<semaphore_mem>> -> memref<!tpu.dma_semaphore, #tpu.memory_space<semaphore_mem>>
    tpu.enqueue_dma source(%arg0 : memref<2x4x16x16xf32, #tpu.memory_space<any>>) target(%arg1 : memref<2x4x16x16xf32, #tpu.memory_space<any>>) target_semaphore(%1 : memref<!tpu.dma_semaphore, #tpu.memory_space<semaphore_mem>>)
    %c0_i32_0 = arith.constant 0 : i32
    %2 = tpu.memref_slice %arg2[%c0_i32_0] : memref<1x!tpu.dma_semaphore, #tpu.memory_space<semaphore_mem>> -> memref<1x!tpu.dma_semaphore, #tpu.memory_space<semaphore_mem>>
    %3 = tpu.memref_squeeze %2 : memref<1x!tpu.dma_semaphore, #tpu.memory_space<semaphore_mem>> -> memref<!tpu.dma_semaphore, #tpu.memory_space<semaphore_mem>>
    tpu.wait_dma2 semaphore(%3 : memref<!tpu.dma_semaphore, #tpu.memory_space<semaphore_mem>>) src(%arg0 : memref<2x4x16x16xf32, #tpu.memory_space<any>>) dst(%arg1 : memref<2x4x16x16xf32, #tpu.memory_space<any>>)
    return
  }
}

</mosaic_0001>

<bundles_post_ra>
// kernel: tpu_custom_call.1
= control target key start
LH: loop header
LB: loop body
LE: loop exit
PB: predicated region body
PF: predicated region fallthrough
CT: control target
= control target key end

     0   :  { %s36_s6 = smov [#allocation2]   ;;  %s37_s7 = smov [#allocation3]   ;;  %s55_s0 = inlined_call_operand.hbm [shape: f32[2,4,16,16], index: 0, kind: input, shape index: {}]   ;;  %s56_s1 = inlined_call_operand.hbm [shape: f32[2,4,16,16], index: 1, kind: output, shape index: {}]  }
   0x1   :  { %s38_s8 = smov 0  }
   0x2   :  { %18 = dma.general %s55_s0, 2048, %s56_s1, %s36_s6, %s37_s7, [#allocation4], %s38_s8, 0  }
   0x3   :  { %34 = dma.done.wait [#allocation2], 2048 }
   0x4   :  { %35 = vsyncadd [#allocation2], 4294965248 }
   0x5   :  { %24 = vsyncmov [#allocation2] }
   0x8   :  { %s25_s13 = vpop.sfrf %24 }
   0x9   :  { %p30_p0 = scmp.ne.s32.totalorder %s25_s13, 0 }
   0xb   :  { %29 = shalt.err (%p30_p0)  }

</bundles_post_ra>
